<compile_context>
chip_gen: v7x
topology: tpu7x:2x2x1
jax: 0.10.0
libtpu: 0.0.40
codegen_flags: <defaults>
</compile_context>

<pallas_src>
import functools

import jax
import jax.numpy as jnp
from jax import lax
from jax.experimental import pallas as pl
from jax.experimental.pallas import tpu as pltpu


def _dmol_conv1x1_kernel(x_ref, w_ref, b_ref, o_ref):
    # x_ref: (C_in, t)   channel-major slab of t pixels (straight from NCHW)
    # w_ref: (C_in, C_out)
    # b_ref: (1, C_out)
    # o_ref: (t, C_out)  NHWC-ordered output block
    acc = lax.dot_general(
        x_ref[...],
        w_ref[...],
        dimension_numbers=(((0,), (0,)), ((), ())),  # contract C_in (implied lhs transpose rides the XLU)
        preferred_element_type=jnp.float32,
    )
    o_ref[...] = (acc + b_ref[...]).astype(o_ref.dtype)


def _pick_spatial_tile(m_sp: int, batch: int, row_budget: int) -> int:
    """Pick the spatial tile t (pixels per grid step).

    Constraints: t divides H*W exactly (no padding) and t is lane-aligned
    (multiple of 128) or equal to the full spatial extent.  Target the
    largest t <= row_budget (mem-bound kernel: big tiles amortize the
    ~0.35us per-step overhead).  Keep >= 2 parallel grid blocks when
    possible so both v7x TensorCores get work.
    """
    if m_sp <= row_budget:
        t = m_sp
    else:
        t = 0
        cand = (row_budget // 128) * 128
        while cand >= 128:
            if m_sp % cand == 0:
                t = cand
                break
            cand -= 128
        if t == 0:
            # No lane-aligned divisor <= budget (unusual non-power-of-2 H*W):
            # full extent is always a legal block shape.
            t = m_sp
    # v7x megacore: avoid collapsing the parallel grid to a single block.
    if batch * (m_sp // t) < 2 and m_sp % 256 == 0:
        t = m_sp // 2
    return t


@functools.partial(jax.jit, static_argnames=("row_budget",))
def dmolnet_forward(px_z, weight, bias, *, row_budget=2048):
    """DmolNet.forward.

    px_z:   (B, C_in, H, W)  float32   (NCHW, like the PyTorch module)
    weight: (C_out, C_in)    float32   (squeezed 1x1 conv weight)
    bias:   (C_out,)         float32
    returns (B, H, W, C_out) float32   (== conv(px_z).permute(0, 2, 3, 1))
    """
    B, C_in, H, W = px_z.shape
    C_out = weight.shape[0]
    M_sp = H * W

    t = _pick_spatial_tile(M_sp, B, row_budget)

    # Only FREE reshapes on HBM (contiguous dim merge/split): the NCHW->NHWC
    # permute is done inside the kernel by contracting the leading channel
    # axis of each (C_in, t) slab.
    x3 = px_z.reshape(B, C_in, M_sp)
    w_mat = weight.T.astype(px_z.dtype)            # (C_in, C_out)
    b_mat = bias.reshape(1, C_out).astype(jnp.float32)

    # NOTE: C_out=100 output lanes are left as-is (masked stores) because the
    # module contract requires a 100-wide NHWC result; padding to 128 would
    # force an extra HBM slice pass downstream.
    out3 = pl.pallas_call(
        _dmol_conv1x1_kernel,
        out_shape=jax.ShapeDtypeStruct((B, M_sp, C_out), px_z.dtype),
        grid=(B, M_sp // t),
        in_specs=[
            pl.BlockSpec((None, C_in, t), lambda b, i: (b, 0, i)),
            pl.BlockSpec((C_in, C_out), lambda b, i: (0, 0)),
            pl.BlockSpec((1, C_out), lambda b, i: (0, 0)),
        ],
        out_specs=pl.BlockSpec((None, t, C_out), lambda b, i: (b, i, 0)),
        compiler_params=pltpu.CompilerParams(
            dimension_semantics=("parallel", "parallel"),
        ),
    )(x3, w_mat, b_mat)

    return out3.reshape(B, H, W, C_out)


if __name__ == "__main__":
    # Hyperparameters implied by DmolNet.__init__ (H.width, H.num_mixtures).
    batch = 2
    width = 32          # H.width
    num_mixtures = 10   # H.num_mixtures
    spatial = 16
    c_out = num_mixtures * 10  # 100

    key = jax.random.PRNGKey(0)
    k_x, k_w = jax.random.split(key)

    px_z = jax.random.normal(k_x, (batch, width, spatial, spatial), dtype=jnp.float32)
    # Conv2d(width, c_out, 1) weight is (c_out, width, 1, 1); zero_bias=True zeroes the bias.
    weight = jax.random.normal(k_w, (c_out, width), dtype=jnp.float32) * 0.05
    bias = jnp.zeros((c_out,), dtype=jnp.float32)

    out = dmolnet_forward(px_z, weight, bias)
    out = jax.block_until_ready(out)

    # Pure-JAX reference of the PyTorch forward: conv1x1 (NCHW) then permute to NHWC.
    ref = jnp.einsum("bchw,oc->bhwo", px_z, weight) + bias[None, None, None, :]

    assert out.shape == (batch, spatial, spatial, c_out), out.shape
    assert jnp.allclose(out, ref, atol=1e-4, rtol=1e-4), float(jnp.max(jnp.abs(out - ref)))

    # TODO(synk): DmolNet.nll / .sample / .get_dmol_stats are separate methods
    # (DMoL loss / sampling), not part of forward(); not implemented here.

    print("KERNEL_OK")
</pallas_src>

<mosaic_0001>
module attributes {stable_mosaic.version = 11 : i64} {
  func.func @_dmol_conv1x1_kernel(%arg0: i32, %arg1: i32, %arg2: memref<1x32x256xf32, #tpu.memory_space<vmem>>, %arg3: memref<32x100xf32, #tpu.memory_space<vmem>>, %arg4: memref<1x100xf32, #tpu.memory_space<vmem>>, %arg5: memref<1x256x100xf32, #tpu.memory_space<vmem>>) attributes {dimension_semantics = [#tpu.dimension_semantics<parallel>, #tpu.dimension_semantics<parallel>], iteration_bounds = array<i64: 2, 1>, scalar_prefetch = 0 : i64, scratch_operands = 0 : i64, tpu.core_type = #tpu.core_type<tc>, window_params = [{transform_indices = @transform_0, window_bounds = array<i64: 1, 32, 256>}, {pipeline_mode = #tpu.pipeline_mode<synchronous>, transform_indices = @transform_1, window_bounds = array<i64: 32, 100>}, {pipeline_mode = #tpu.pipeline_mode<synchronous>, transform_indices = @transform_2, window_bounds = array<i64: 1, 100>}, {transform_indices = @transform_3, window_bounds = array<i64: 1, 256, 100>}]} {
    %c0 = arith.constant 0 : index
    %c0_0 = arith.constant 0 : index
    %c0_1 = arith.constant 0 : index
    %0 = vector.load %arg2[%c0, %c0_0, %c0_1] : memref<1x32x256xf32, #tpu.memory_space<vmem>>, vector<1x32x256xf32>
    %1 = vector.shape_cast %0 : vector<1x32x256xf32> to vector<32x256xf32>
    %c0_2 = arith.constant 0 : index
    %c0_3 = arith.constant 0 : index
    %2 = vector.load %arg3[%c0_2, %c0_3] : memref<32x100xf32, #tpu.memory_space<vmem>>, vector<32x100xf32>
    %cst = arith.constant dense<0.000000e+00> : vector<256x100xf32>
    %3 = tpu.matmul %1, %2, %cst {dimension_numbers = #tpu.dot_dimension_numbers<[0], [0], [1], [1], [0, 1, 1, 1], [], []>} : vector<32x256xf32>, vector<32x100xf32>, vector<256x100xf32> -> vector<256x100xf32>
    %c0_4 = arith.constant 0 : index
    %c0_5 = arith.constant 0 : index
    %4 = vector.load %arg4[%c0_4, %c0_5] : memref<1x100xf32, #tpu.memory_space<vmem>>, vector<1x100xf32>
    %5 = vector.broadcast %4 : vector<1x100xf32> to vector<256x100xf32>
    %6 = arith.addf %3, %5 : vector<256x100xf32>
    %c0_6 = arith.constant 0 : index
    %c0_7 = arith.constant 0 : index
    %c0_8 = arith.constant 0 : index
    %7 = vector.load %arg5[%c0_6, %c0_7, %c0_8] : memref<1x256x100xf32, #tpu.memory_space<vmem>>, vector<1x256x100xf32>
    %8 = vector.shape_cast %7 : vector<1x256x100xf32> to vector<256x100xf32>
    %9 = vector.shape_cast %6 : vector<256x100xf32> to vector<1x256x100xf32>
    tpu.vector_store %arg5[%c0_6, %c0_7, %c0_8], %9 {strides = array<i32>} : memref<1x256x100xf32, #tpu.memory_space<vmem>>, vector<1x256x100xf32>,
    return
  }
  func.func @transform_0(%arg0: i32, %arg1: i32) -> (i32, i32, i32) {
    %c0_i32 = arith.constant 0 : i32
    %c0_i32_0 = arith.constant 0 : i32
    return %arg0, %c0_i32, %arg1 : i32, i32, i32
  }
  func.func @transform_1(%arg0: i32, %arg1: i32) -> (i32, i32) {
    %c0_i32 = arith.constant 0 : i32
    %c0_i32_0 = arith.constant 0 : i32
    %c0_i32_1 = arith.constant 0 : i32
    return %c0_i32, %c0_i32_0 : i32, i32
  }
  func.func @transform_2(%arg0: i32, %arg1: i32) -> (i32, i32) {
    %c0_i32 = arith.constant 0 : i32
    %c0_i32_0 = arith.constant 0 : i32
    %c0_i32_1 = arith.constant 0 : i32
    return %c0_i32, %c0_i32_0 : i32, i32
  }
  func.func @transform_3(%arg0: i32, %arg1: i32) -> (i32, i32, i32) {
    %c0_i32 = arith.constant 0 : i32
    %c0_i32_0 = arith.constant 0 : i32
    return %arg0, %arg1, %c0_i32 : i32, i32, i32
  }
}

</mosaic_0001>

<bundles_post_ra>
// kernel: dmolnet_forward.1
= control target key start
LH: loop header
LB: loop body
LE: loop exit
PB: predicated region body
PF: predicated region fallthrough
CT: control target
= control target key end

     0   :  { %8 = vsyncpa [#allocation3], 0  ;;  %s1313_s0 = inlined_call_operand.vmem [shape: f32[2,32,256], index: 0, kind: input, shape index: {}]   ;;  %s1314_s1 = inlined_call_operand.vmem [shape: f32[32,100], index: 1, kind: input, shape index: {}]   ;;  %s1315_s2 = inlined_call_operand.vmem [shape: f32[1,100], index: 2, kind: input, shape index: {}]   ;;  %s1316_s3 = inlined_call_operand.hbm [shape: f32[2,256,100], index: 3, kind: output, shape index: {}]  }
   0x1   :  { %10 = vsyncpa [#allocation3 + $0x1], 0  ;;  %s1046_s12 = smov 0   ;;  %s1048_s13 = smov 0  }
   0x2   :  { %s1050_s14 = smov 0   ;;  %s1052_s15 = smov 0  }
   0x3   :  { %s1054_s16 = smov 0   ;;  %s1056_s17 = smov 0  }
   0x4 LB: > { %s733_s18 = sadd.s32 4294967295, %s1021_s17   ;;  %s734_s19 = sadd.s32 4294967294, %s1021_s17   ;;  %s1021_s17 = sphi %s1056_s17, %s16_s17   ;;  %s1017_s16 = sphi %s1054_s16, %s1323_s16   ;;  %s1013_s15 = sphi %s1052_s15, %s1322_s15   ;;  %s1009_s14 = sphi %s1050_s14, %s1321_s14   ;;  %s1005_s13 = sphi %s1048_s13, %s1320_s13   ;;  %s1001_s12 = sphi %s1046_s12, %s1319_s12  }
   0x5   : > { %s28_s20 = sadd.s32 1, %s1017_s16  ;;  %s107_s21 = sadd.s32 1, %s1009_s14 }
   0x6   : > { %p30_p0 = scmp.ge.s32.totalorder %s28_s20, 2  ;;  %p117_p1 = scmp.ne.s32.totalorder %s1009_s14, %s1005_s13 }
   0x7   : > { %p118_p2 = scmp.eq.s32.totalorder %s733_s18, 1  ;;  %p123_p3 = scmp.ne.s32.totalorder %s1005_s13, %s1001_s12 }
   0x8   : > { %s1325_s20 = smov (%p30_p0, %s28_s20), 0  ;;  %p124_p5 = scmp.eq.s32.totalorder %s734_s19, 1 }
   0x9   : > { %p1086_p4 = por %p118_p2, %p117_p1  ;;  %s102_s23 = ssub.s32 %s1017_s16, %s1325_s20 }
   0xa   : > { %p737_p6 = scmp.ge.s32.totalorder %s1021_s17, 1  ;;  %p105_p7 = scmp.eq.s32.totalorder %s102_s23, 0 }
   0xb   : > { %p1093_p8 = por %p124_p5, %p123_p3  ;;  %p161_p9 = scmp.lt.s32.totalorder %s1021_s17, 3 }
   0xc   : > { %s1099_s25 = scalar_select %p105_p7, %s1009_s14, %s107_s21  }
   0xd   : > { %p162_p10 = pnand %p737_p6, %p161_p9 }
   0xe   : > { %p190_p11 = scmp.lt.s32.totalorder (!%p162_p10), %s1013_s15, 1  ;;  %v208_v0 = vld [vmem:[%s1314_s1] sm:$0xff] (!%p162_p10)  ;;  %v209_v1 = vld [vmem:[%s1314_s1 + $0x8] sm:$0xff] (!%p162_p10)  ;;  %v210_v3 = vld [vmem:[%s1314_s1 + $0x10] sm:$0xff] (!%p162_p10)  ;;  %vm283_vm0 = vcmask (!%p162_p10), 261120   ;;  %s186_s18 = sand.u32 (!%p162_p10), 1, %s1005_s13  }
   0xf   : > { %165 = sbr.rel (%p162_p10) target bundleno = 446 (0x1be), region = 32  ;;  %v873_v2 = vpack.c.bf16 (!%p162_p10), %v209_v1, %v208_v0  ;;  %v211_v4 = vld [vmem:[%s1314_s1 + $0x18] sm:$0xff] (!%p162_p10)  ;;  %s738_s19 = sshll.u32 (!%p162_p10), %s186_s18, 8  ;;  %v1156_v46 = vld [vmem:[%s1315_s2] ss:$0 sm:$0xff] (!%p162_p10)  ;;  %vm605_vm1 = vcmask (!%p162_p10), 818176  }
  0x10   : > { %v877_v7 = vpack.c.bf16 (!%p162_p10), %v211_v4, %v210_v3  ;;  %s1162_s26 = scalar_lea.vmem (!%p162_p10), [#allocation2], %s738_s19  ;;  %s780_s27 = sshll.u32 (!%p162_p10), %s1013_s15, 12 }
  0x11   : > { %874 = vmatprep.subr.bf16.mxu0 (!%p162_p10), %v873_v2  ;;  %881 = vmatprep.subr.bf16.mxu1 (!%p162_p10), %v873_v2  ;;  %s654_s28 = sshll.u32 (!%p162_p10), %s1162_s26, 4  ;;  %s1023_s6 = smov (!%p162_p10), [#allocation2]   ;;  %s1253_s28 = int_to_ptr.vmem [resolvable:$true] %s654_s28 }
  0x12   : > { %876 = vmatpush3.bf16.msra.mxu0 (!%p162_p10), %v873_v2  ;;  %883 = vmatpush3.bf16.msra.mxu1 (!%p162_p10), %v873_v2  ;;  %s943_s5 = scalar_lea.vmem (!%p162_p10), %s1253_s28, 4096 }
  0x13   : > { %878 = vmatprep.subr.bf16.mxu0 (!%p162_p10), %v877_v7  ;;  %882 = vmatprep.subr.bf16.mxu1 (!%p162_p10), %v877_v7  ;;  %p944_p12 = scmp.ne.s32.totalorder (!%p162_p10), %s1253_s28, %s943_s5 }
  0x15   : > { %p945_p13 = pnand (!%p162_p10), %p944_p12, %p1086_p4 }
  0x16   : > { %s191_s30 = scalar_select %p190_p11, %s1013_s15, 1  ;;  %880 = vmatpush3.bf16.msra.mxu0 %v877_v7  ;;  %884 = vmatpush3.bf16.msra.mxu1 %v877_v7 }
  0x17   : > { %s1267_s15 = scalar_lea.sflag [#allocation3], %s186_s18  ;;  %p946_p0 = pneg %p945_p13 }
  0x18   : > { %s779_s4 = sshll.u32 %s191_s30, 6 }
  0x19   : > { %s197_s7 = scalar_lea.vmem %s1313_s0, %s779_s4  ;;  %s1251_s4 = scalar_lea.hbm %s1316_s3, %s780_s27 }
  0x1a   : > { %v201_v5 = vld [vmem:[%s197_s7 + $0x8] sm:$0xff]  ;;  %v200_v6 = vld [vmem:[%s197_s7] sm:$0xff]  ;;  %v203_v8 = vld [vmem:[%s197_s7 + $0x18] sm:$0xff] }
  0x1b   : > { %251 = vxpose.xlu1.b32.start [1/4] (short) %v201_v5, 128  ;;  %219 = vxpose.xlu0.b32.start [1/4] (short) %v200_v6, 128  ;;  %v202_v9 = vld [vmem:[%s197_s7 + $0x10] sm:$0xff]  ;;  %v205_v10 = vld [vmem:[%s197_s7 + $0x28] sm:$0xff]  ;;  %v204_v11 = vld [vmem:[%s197_s7 + $0x20] sm:$0xff] }
  0x1c   : > { %v207_v12 = vld [vmem:[%s197_s7 + $0x38] sm:$0xff]  ;;  %v206_v13 = vld [vmem:[%s197_s7 + $0x30] sm:$0xff]  ;;  %s947_s7 = sshll.u32 %s1023_s6, 4  ;;  %s948_s7 = int_to_ptr.vmem [resolvable:$false] %s947_s7 }
  0x1d   : > { %s949_s8 = scalar_lea.vmem %s948_s7, 8192  ;;  %p950_p1 = scmp.lt.s32.totalorder %s1253_s28, %s948_s7 }
  0x1e   : > { %p951_p2 = scmp.lt.s32.totalorder %s949_s8, %s943_s5 }
  0x1f   : > { %252 = vxpose.xlu1.b32.cont [2/4] (short) %v203_v8, 128  ;;  %220 = vxpose.xlu0.b32.cont [2/4] (short) %v202_v9, 128 }
  0x20   : > { %p952_p3 = por %p951_p2, %p950_p1 }
  0x22   : > { %p953_p5 = pnand %p952_p3, %p946_p0 }
  0x23   : > { %253 = vxpose.xlu1.b32.cont [3/4] (short) %v205_v10, 128  ;;  %221 = vxpose.xlu0.b32.cont [3/4] (short) %v204_v11, 128 }
  0x27   : > { %254 = vxpose.xlu1.b32.end [4/4] (short) %v207_v12, 128  ;;  %222 = vxpose.xlu0.b32.end [4/4] (short) %v206_v13, 128 }
  0x9b   : > { %v267_v14 = vpop.trf.xlu1  ;;  %v235_v15 = vpop.trf.xlu0 }
  0x9c   : > { %825 = vmatprep.mubr.msk.f32.mxu0 %vm283_vm0, %v235_v15  ;;  %849 = vmatprep.mubr.msk.f32.mxu1 %vm283_vm0, %v267_v14 }
  0x9f   : > { %v268_v16 = vpop.trf.xlu1  ;;  %v236_v17 = vpop.trf.xlu0 }
  0xa0   : > { %826 = vmatmul.mubr.msk.f32.vlgmr.msra.gmra.mrb[0].mxu0 %vm283_vm0, %v236_v17  ;;  %850 = vmatmul.mubr.msk.f32.vlgmr.msra.gmra.mrb[0].mxu1 %vm283_vm0, %v268_v16 }
  0xa3   : > { %v269_v18 = vpop.trf.xlu1  ;;  %v237_v19 = vpop.trf.xlu0 }
  0xa4   : > { %828 = vmatprep.mubr.msk.f32.mxu0 %vm283_vm0, %v237_v19  ;;  %852 = vmatprep.mubr.msk.f32.mxu1 %vm283_vm0, %v269_v18 }
  0xa7   : > { %v270_v20 = vpop.trf.xlu1  ;;  %v238_v21 = vpop.trf.xlu0 }
  0xa8   : > { %829 = vmatmul.mubr.msk.f32.gmra.mrb[2].mxu0 %vm283_vm0, %v238_v21  ;;  %853 = vmatmul.mubr.msk.f32.gmra.mrb[2].mxu1 %vm283_vm0, %v270_v20 }
  0xab   : > { %v271_v22 = vpop.trf.xlu1  ;;  %v239_v23 = vpop.trf.xlu0 }
  0xac   : > { %831 = vmatprep.mubr.msk.f32.mxu0 %vm283_vm0, %v239_v23  ;;  %855 = vmatprep.mubr.msk.f32.mxu1 %vm283_vm0, %v271_v22 }
  0xaf   : > { %v272_v24 = vpop.trf.xlu1  ;;  %v240_v25 = vpop.trf.xlu0 }
  0xb0   : > { %832 = vmatmul.mubr.msk.f32.gmra.mrb[4].mxu0 %vm283_vm0, %v240_v25  ;;  %856 = vmatmul.mubr.msk.f32.gmra.mrb[4].mxu1 %vm283_vm0, %v272_v24 }
  0xb3   : > { %v273_v26 = vpop.trf.xlu1  ;;  %v241_v27 = vpop.trf.xlu0 }
  0xb4   : > { %834 = vmatprep.mubr.msk.f32.mxu0 %vm283_vm0, %v241_v27  ;;  %858 = vmatprep.mubr.msk.f32.mxu1 %vm283_vm0, %v273_v26 }
  0xb7   : > { %v274_v28 = vpop.trf.xlu1  ;;  %v242_v29 = vpop.trf.xlu0 }
  0xb8   : > { %835 = vmatmul.mubr.msk.f32.gmra.mrb[6].mxu0 %vm283_vm0, %v242_v29  ;;  %859 = vmatmul.mubr.msk.f32.gmra.mrb[6].mxu1 %vm283_vm0, %v274_v28 }
  0xbb   : > { %v275_v30 = vpop.trf.xlu1  ;;  %v243_v31 = vpop.trf.xlu0 }
  0xbc   : > { %837 = vmatprep.mubr.msk.f32.mxu0 %vm283_vm0, %v243_v31  ;;  %861 = vmatprep.mubr.msk.f32.mxu1 %vm283_vm0, %v275_v30 }
  0xbf   : > { %v276_v32 = vpop.trf.xlu1  ;;  %v244_v33 = vpop.trf.xlu0 }
  0xc0   : > { %838 = vmatmul.mubr.msk.f32.gmra.mrb[8].mxu0 %vm283_vm0, %v244_v33  ;;  %862 = vmatmul.mubr.msk.f32.gmra.mrb[8].mxu1 %vm283_vm0, %v276_v32 }
  0xc3   : > { %v277_v34 = vpop.trf.xlu1  ;;  %v245_v35 = vpop.trf.xlu0 }
  0xc4   : > { %840 = vmatprep.mubr.msk.f32.mxu0 %vm283_vm0, %v245_v35  ;;  %864 = vmatprep.mubr.msk.f32.mxu1 %vm283_vm0, %v277_v34 }
  0xc7   : > { %v278_v36 = vpop.trf.xlu1  ;;  %v246_v37 = vpop.trf.xlu0 }
  0xc8   : > { %841 = vmatmul.mubr.msk.f32.gmra.mrb[10].mxu0 %vm283_vm0, %v246_v37  ;;  %865 = vmatmul.mubr.msk.f32.gmra.mrb[10].mxu1 %vm283_vm0, %v278_v36 }
  0xcb   : > { %v279_v38 = vpop.trf.xlu1  ;;  %v247_v39 = vpop.trf.xlu0 }
  0xcc   : > { %843 = vmatprep.mubr.msk.f32.mxu0 %vm283_vm0, %v247_v39  ;;  %867 = vmatprep.mubr.msk.f32.mxu1 %vm283_vm0, %v279_v38 }
  0xcf   : > { %v280_v40 = vpop.trf.xlu1  ;;  %v248_v41 = vpop.trf.xlu0 }
  0xd0   : > { %844 = vmatmul.mubr.msk.f32.gmra.mrb[12].mxu0 %vm283_vm0, %v248_v41  ;;  %868 = vmatmul.mubr.msk.f32.gmra.mrb[12].mxu1 %vm283_vm0, %v280_v40 }
  0xd3   : > { %v281_v42 = vpop.trf.xlu1  ;;  %v249_v43 = vpop.trf.xlu0 }
  0xd4   : > { %846 = vmatprep.mubr.msk.f32.mxu0 %vm283_vm0, %v249_v43  ;;  %870 = vmatprep.mubr.msk.f32.mxu1 %vm283_vm0, %v281_v42 }
  0xd7   : > { %v282_v44 = vpop.trf.xlu1  ;;  %v250_v45 = vpop.trf.xlu0 }
  0xd8   : > { %847 = vmatmul.mubr.msk.f32.gmra.mrb[14].mxu0 %vm283_vm0, %v250_v45  ;;  %871 = vmatmul.mubr.msk.f32.gmra.mrb[14].mxu1 %vm283_vm0, %v282_v44 }
 0x173   : > { %v827_v47 = vpop.f32.mrb[0].mxu0  ;;  %v851_v48 = vpop.f32.mrb[0].mxu1 }
 0x174   : > { %v452_v49 = vadd.f32 %v827_v47, %v1156_v46  ;;  %v532_v50 = vadd.f32 %v851_v48, %v1156_v46  ;;  %v446_v51 = vpop.f32.mrb[1].mxu0  ;;  %v526_v52 = vpop.f32.mrb[1].mxu1 }
 0x175   : > { %v447_v53 = vadd.f32 %v1156_v46, %v446_v51  ;;  %v527_v54 = vadd.f32 %v1156_v46, %v526_v52 }
 0x176   : > { %607 = vst.msk [vmem:[%s1162_s26 + $0x8] sm:$0xff] %vm605_vm1, %v452_v49  ;;  %623 = vst.msk [vmem:[%s1162_s26 + $0x88] sm:$0xff] %vm605_vm1, %v532_v50 }
 0x177   : > { %606 = vst.msk [vmem:[%s1162_s26] sm:$0xff] %vm605_vm1, %v447_v53  ;;  %622 = vst.msk [vmem:[%s1162_s26 + $0x80] sm:$0xff] %vm605_vm1, %v527_v54 }
 0x17b   : > { %v830_v55 = vpop.f32.mrb[2].mxu0  ;;  %v854_v56 = vpop.f32.mrb[2].mxu1 }
 0x17c   : > { %v462_v57 = vadd.f32 %v830_v55, %v1156_v46  ;;  %v542_v58 = vadd.f32 %v854_v56, %v1156_v46  ;;  %v456_v59 = vpop.f32.mrb[3].mxu0  ;;  %v536_v60 = vpop.f32.mrb[3].mxu1 }
 0x17d   : > { %v457_v61 = vadd.f32 %v1156_v46, %v456_v59  ;;  %v537_v62 = vadd.f32 %v1156_v46, %v536_v60 }
 0x17e   : > { %609 = vst.msk [vmem:[%s1162_s26 + $0x18] sm:$0xff] %vm605_vm1, %v462_v57  ;;  %625 = vst.msk [vmem:[%s1162_s26 + $0x98] sm:$0xff] %vm605_vm1, %v542_v58 }
 0x17f   : > { %608 = vst.msk [vmem:[%s1162_s26 + $0x10] sm:$0xff] %vm605_vm1, %v457_v61  ;;  %624 = vst.msk [vmem:[%s1162_s26 + $0x90] sm:$0xff] %vm605_vm1, %v537_v62 }
 0x183   : > { %v833_v63 = vpop.f32.mrb[4].mxu0  ;;  %v857_v0 = vpop.f32.mrb[4].mxu1 }
 0x184   : > { %v472_v1 = vadd.f32 %v833_v63, %v1156_v46  ;;  %v552_v2 = vadd.f32 %v857_v0, %v1156_v46  ;;  %v466_v3 = vpop.f32.mrb[5].mxu0  ;;  %v546_v4 = vpop.f32.mrb[5].mxu1 }
 0x185   : > { %v467_v5 = vadd.f32 %v1156_v46, %v466_v3  ;;  %v547_v6 = vadd.f32 %v1156_v46, %v546_v4 }
 0x186   : > { %611 = vst.msk [vmem:[%s1162_s26 + $0x28] sm:$0xff] %vm605_vm1, %v472_v1  ;;  %627 = vst.msk [vmem:[%s1162_s26 + $0xa8] sm:$0xff] %vm605_vm1, %v552_v2 }
 0x187   : > { %610 = vst.msk [vmem:[%s1162_s26 + $0x20] sm:$0xff] %vm605_vm1, %v467_v5  ;;  %626 = vst.msk [vmem:[%s1162_s26 + $0xa0] sm:$0xff] %vm605_vm1, %v547_v6 }
 0x18b   : > { %v836_v7 = vpop.f32.mrb[6].mxu0  ;;  %v860_v8 = vpop.f32.mrb[6].mxu1 }
 0x18c   : > { %v482_v9 = vadd.f32 %v836_v7, %v1156_v46  ;;  %v562_v10 = vadd.f32 %v860_v8, %v1156_v46  ;;  %v476_v11 = vpop.f32.mrb[7].mxu0  ;;  %v556_v12 = vpop.f32.mrb[7].mxu1 }
 0x18d   : > { %v477_v13 = vadd.f32 %v1156_v46, %v476_v11  ;;  %v557_v14 = vadd.f32 %v1156_v46, %v556_v12 }
 0x18e   : > { %613 = vst.msk [vmem:[%s1162_s26 + $0x38] sm:$0xff] %vm605_vm1, %v482_v9  ;;  %629 = vst.msk [vmem:[%s1162_s26 + $0xb8] sm:$0xff] %vm605_vm1, %v562_v10 }
 0x18f   : > { %612 = vst.msk [vmem:[%s1162_s26 + $0x30] sm:$0xff] %vm605_vm1, %v477_v13  ;;  %628 = vst.msk [vmem:[%s1162_s26 + $0xb0] sm:$0xff] %vm605_vm1, %v557_v14 }
 0x193   : > { %v839_v15 = vpop.f32.mrb[8].mxu0  ;;  %v863_v16 = vpop.f32.mrb[8].mxu1 }
 0x194   : > { %v492_v17 = vadd.f32 %v839_v15, %v1156_v46  ;;  %v572_v18 = vadd.f32 %v863_v16, %v1156_v46  ;;  %v486_v19 = vpop.f32.mrb[9].mxu0  ;;  %v566_v20 = vpop.f32.mrb[9].mxu1 }
 0x195   : > { %v487_v21 = vadd.f32 %v1156_v46, %v486_v19  ;;  %v567_v22 = vadd.f32 %v1156_v46, %v566_v20 }
 0x196   : > { %615 = vst.msk [vmem:[%s1162_s26 + $0x48] sm:$0xff] %vm605_vm1, %v492_v17  ;;  %631 = vst.msk [vmem:[%s1162_s26 + $0xc8] sm:$0xff] %vm605_vm1, %v572_v18 }
 0x197   : > { %614 = vst.msk [vmem:[%s1162_s26 + $0x40] sm:$0xff] %vm605_vm1, %v487_v21  ;;  %630 = vst.msk [vmem:[%s1162_s26 + $0xc0] sm:$0xff] %vm605_vm1, %v567_v22 }
 0x19b   : > { %v842_v23 = vpop.f32.mrb[10].mxu0  ;;  %v866_v24 = vpop.f32.mrb[10].mxu1 }
 0x19c   : > { %v502_v25 = vadd.f32 %v842_v23, %v1156_v46  ;;  %v582_v26 = vadd.f32 %v866_v24, %v1156_v46  ;;  %v496_v27 = vpop.f32.mrb[11].mxu0  ;;  %v576_v28 = vpop.f32.mrb[11].mxu1 }
 0x19d   : > { %v497_v29 = vadd.f32 %v1156_v46, %v496_v27  ;;  %v577_v30 = vadd.f32 %v1156_v46, %v576_v28 }
 0x19e   : > { %617 = vst.msk [vmem:[%s1162_s26 + $0x58] sm:$0xff] %vm605_vm1, %v502_v25  ;;  %633 = vst.msk [vmem:[%s1162_s26 + $0xd8] sm:$0xff] %vm605_vm1, %v582_v26 }
 0x19f   : > { %616 = vst.msk [vmem:[%s1162_s26 + $0x50] sm:$0xff] %vm605_vm1, %v497_v29  ;;  %632 = vst.msk [vmem:[%s1162_s26 + $0xd0] sm:$0xff] %vm605_vm1, %v577_v30 }
 0x1a3   : > { %v845_v31 = vpop.f32.mrb[12].mxu0  ;;  %v869_v32 = vpop.f32.mrb[12].mxu1 }
 0x1a4   : > { %v512_v33 = vadd.f32 %v845_v31, %v1156_v46  ;;  %v592_v34 = vadd.f32 %v869_v32, %v1156_v46  ;;  %v506_v35 = vpop.f32.mrb[13].mxu0  ;;  %v586_v36 = vpop.f32.mrb[13].mxu1 }
 0x1a5   : > { %v507_v37 = vadd.f32 %v1156_v46, %v506_v35  ;;  %v587_v38 = vadd.f32 %v1156_v46, %v586_v36 }
 0x1a6   : > { %619 = vst.msk [vmem:[%s1162_s26 + $0x68] sm:$0xff] %vm605_vm1, %v512_v33  ;;  %635 = vst.msk [vmem:[%s1162_s26 + $0xe8] sm:$0xff] %vm605_vm1, %v592_v34 }
 0x1a7   : > { %618 = vst.msk [vmem:[%s1162_s26 + $0x60] sm:$0xff] %vm605_vm1, %v507_v37  ;;  %634 = vst.msk [vmem:[%s1162_s26 + $0xe0] sm:$0xff] %vm605_vm1, %v587_v38 }
 0x1ab   : > { %v848_v39 = vpop.f32.mrb[14].mxu0  ;;  %v872_v40 = vpop.f32.mrb[14].mxu1 }
 0x1ac   : > { %v522_v41 = vadd.f32 %v848_v39, %v1156_v46  ;;  %v602_v42 = vadd.f32 %v872_v40, %v1156_v46  ;;  %v516_v43 = vpop.f32.mrb[15].mxu0  ;;  %v596_v44 = vpop.f32.mrb[15].mxu1 }
 0x1ad   : > { %v517_v45 = vadd.f32 %v1156_v46, %v516_v43  ;;  %v597_v47 = vadd.f32 %v1156_v46, %v596_v44 }
 0x1ae   : > { %621 = vst.msk [vmem:[%s1162_s26 + $0x78] sm:$0xff] %vm605_vm1, %v522_v41  ;;  %637 = vst.msk [vmem:[%s1162_s26 + $0xf8] sm:$0xff] %vm605_vm1, %v602_v42 }
 0x1af   : > { %620 = vst.msk [vmem:[%s1162_s26 + $0x70] sm:$0xff] %vm605_vm1, %v517_v45  ;;  %636 = vst.msk [vmem:[%s1162_s26 + $0xf0] sm:$0xff] %vm605_vm1, %v597_v47 }
 0x1b0   : > { %956 = shalt.err (!%p953_p5)
}
 0x1b1   : > { %s957_s9 = scalar_lea.hbm %s1251_s4, 4096  ;;  %s961_s18 = scalar_lea.hbm %s1316_s3, 8192 }
 0x1b2   : > { %p958_p6 = scmp.ne.s32.totalorder %s1251_s4, %s957_s9  ;;  %p962_p10 = scmp.lt.u32.totalorder %s1251_s4, %s1316_s3 }
 0x1b3   : > { %p963_p11 = scmp.lt.u32.totalorder %s961_s18, %s957_s9  ;;  %p965_p13 = scmp.lt.u32.totalorder %s957_s9, %s1251_s4 }
 0x1b4   : > { %p959_p7 = pnand %p958_p6, %p1086_p4 }
 0x1b5   : > { %p964_p12 = por %p963_p11, %p962_p10 }
 0x1b6   : > { %p960_p9 = pneg %p959_p7 }
 0x1b7   : > { %p966_p0 = por %p965_p13, %p964_p12 }
 0x1b9   : > { %p967_p1 = pnand %p966_p0, %p960_p9 }
 0x1bb   : > { %970 = shalt.err (!%p967_p1)
}
 0x1bc   : > { %s1024_s23 = smov 128   ;;  %s1025_s26 = smov 8  }
 0x1bd   : > { %885 = dma.vmem_to_hbm [thread:$0]  (%p1086_p4), %s1253_s28, 4096, %s1251_s4, %s1267_s15, %s1024_s23, %s1024_s23, %s1025_s26  }
 0x1be PF: > { %p891_p2 = scmp.ge.s32.totalorder %s1021_s17, 2  ;;  %s669_s27 = sand.u32 1, %s1001_s12  }
 0x1bf   : > { %s670_s29 = scalar_lea.sflag [#allocation3], %s669_s27 }
 0x1c0   : > { %p888_p3 = pnand %p891_p2, %p1093_p8 }
 0x1c2   : > { %996 = dma.done.wait (!%p888_p3), %s670_s29, 4096  }
 0x1c3   : > { %998 = vsyncadd (!%p888_p3), %s670_s29, 4294963200  ;;  %s16_s17 = sadd.s32 1, %s1021_s17   ;;  %s1319_s12 = smov %s1005_s13 }
 0x1c4   : > { %p13_p5 = scmp.ge.s32.totalorder %s16_s17, 4   ;;  %s1320_s13 = smov %s1009_s14 }
 0x1c5   : > { %s1321_s14 = smov %s1099_s25  ;;  %s1322_s15 = smov %s1017_s16 }
 0x1c6   : > { %s1323_s16 = smov %s1325_s20  ;;  %15 = sbr.rel (!%p13_p5) target bundleno = 4 (0x4), region = 67 }
 0x1cd   :  { %675 = vsyncpa [#allocation3], 1 }
 0x1ce   :  { %677 = vsyncpa [#allocation3 + $0x1], 1 }

</bundles_post_ra>
